<compile_context>
chip_gen: v7x
topology: tpu7x:2x2x1
jax: 0.10.0
libtpu: 0.0.40
codegen_flags: <defaults>
</compile_context>

<pallas_src>
import functools

import jax
import jax.numpy as jnp
from jax.experimental import pallas as pl
from jax.experimental.pallas import tpu as pltpu


# ---------------------------------------------------------------------------
# Fused channel-attention kernel
# ---------------------------------------------------------------------------
def channel_attention_kernel(x_ref, p_ref, o_ref, *, cr):
    # x_ref : (Nb, C, HW)    identity activations, H*W in the lane dimension
    # p_ref : (C, 3*cr + 1)  packed params:
    #                          [:, 0:cr]            = w1ᵀ  (in, out)
    #                          [:, cr:2cr]          = w2   (out, in)
    #                          [:, 2cr]             = b2
    #                          [0, 2cr+1 : 3cr+1]   = b1
    # o_ref : (Nb, C, HW)
    x = x_ref[...].astype(jnp.float32)                       # (Nb, C, HW)
    inv_hw = 1.0 / x.shape[-1]

    # AdaptiveAvgPool2d((1,1)): per-channel spatial mean (lane reduce).
    avg = jnp.sum(x, axis=-1, keepdims=True) * inv_hw        # (Nb, C, 1)

    p = p_ref[...]                                           # (C, 3*cr+1)
    w1t = p[:, 0:cr]                                         # (C, Cr)
    w2 = p[:, cr:2 * cr]                                     # (C, Cr)
    b2 = p[:, 2 * cr:2 * cr + 1]                             # (C, 1)
    b1 = p[0:1, 2 * cr + 1:3 * cr + 1]                       # (1, Cr)

    # conv1 (1x1, C -> Cr): broadcast-multiply + sublane reduce (no degenerate MXU).
    z = jnp.sum(w1t[None] * avg, axis=1, keepdims=True) + b1[None]    # (Nb, 1, Cr)
    # ELU(alpha=1); exp argument clamped to <= 0 to avoid spurious overflow.
    z = jnp.where(z > 0, z, jnp.exp(jnp.minimum(z, 0.0)) - 1.0)

    # conv2 (1x1, Cr -> C): broadcast-multiply + lane reduce.
    g = jnp.sum(w2[None] * z, axis=-1, keepdims=True) + b2[None]      # (Nb, C, 1)
    s = jax.nn.sigmoid(g)                                    # (Nb, C, 1)

    # Channel-wise rescale of the identity; lane-dense store.
    o_ref[...] = (x * s).astype(o_ref.dtype)


def _choose_batch_block(n, per_batch_bytes, target_bytes):
    """Largest divisor of n whose block is ~target_bytes, keeping >=2 grid steps."""
    nb = max(1, min(n, target_bytes // per_batch_bytes))
    if n >= 2:
        nb = max(1, min(nb, n // 2))   # >=2 steps so both v7x TensorCores get work
    while n % nb != 0:
        nb -= 1
    return nb


def channel_attention(x_nchw, w1, b1, w2, b2, *, target_block_bytes=1 << 20):
    """x_nchw: (N, C, H, W).  w1: (C//4, C), b1: (C//4,), w2: (C, C//4), b2: (C,)."""
    N, C, H, W = x_nchw.shape
    Cr = w1.shape[0]
    HW = H * W
    P = 3 * Cr + 1

    x2 = x_nchw.reshape(N, C, HW)      # free view: NCHW is contiguous this way

    # Pack all conv params into one small slab -> one DMA / one padded VMEM tile.
    params = jnp.zeros((C, P), jnp.float32)
    params = params.at[:, 0:Cr].set(jnp.transpose(w1).astype(jnp.float32))
    params = params.at[:, Cr:2 * Cr].set(w2.astype(jnp.float32))
    params = params.at[:, 2 * Cr].set(b2.astype(jnp.float32))
    params = params.at[0, 2 * Cr + 1:3 * Cr + 1].set(b1.astype(jnp.float32))

    per_batch_bytes = C * HW * x2.dtype.itemsize
    nb = _choose_batch_block(N, per_batch_bytes, target_block_bytes)
    grid = (N // nb,)
    block_bytes = nb * per_batch_bytes

    # Double-buffered in + out blocks (+ params tile); only raise the scoped VMEM
    # limit when the default (16 MiB on v5e) would be too small.  Cap well under
    # v7x's 64 MiB physical VMEM.
    vmem_needed = 2 * 2 * block_bytes + 2 * 8 * 128 * 4
    cp_kwargs = dict(dimension_semantics=("parallel",))
    if vmem_needed > 12 * 1024 * 1024:
        cp_kwargs["vmem_limit_bytes"] = int(min(1.5 * vmem_needed, 56 * 1024 * 1024))
    # TODO(synk): for production shapes where a single (nb, C, H*W) slab exceeds the
    # VMEM budget (first on v7x's 64 MiB), add an 'arbitrary' HW grid axis with a
    # two-pass pool-then-rescale scheme instead of shrinking nb to a tiny tile.

    kernel = functools.partial(channel_attention_kernel, cr=Cr)
    out = pl.pallas_call(
        kernel,
        out_shape=jax.ShapeDtypeStruct((N, C, HW), x2.dtype),
        grid=grid,
        in_specs=[
            pl.BlockSpec((nb, C, HW), lambda n: (n, 0, 0)),
            pl.BlockSpec((C, P), lambda n: (0, 0)),
        ],
        out_specs=pl.BlockSpec((nb, C, HW), lambda n: (n, 0, 0)),
        input_output_aliases={0: 0},
        compiler_params=pltpu.CompilerParams(**cp_kwargs),
    )(x2, params)

    return out.reshape(N, C, H, W)


# ---------------------------------------------------------------------------
# Pure-JAX reference (mirrors the PyTorch module)
# ---------------------------------------------------------------------------
def ref_channel_attention(x, w1, b1, w2, b2):
    avg = jnp.mean(x, axis=(2, 3))                           # (N, C)
    z = avg @ w1.T + b1                                      # (N, Cr)
    z = jnp.where(z > 0, z, jnp.exp(jnp.minimum(z, 0.0)) - 1.0)
    s = jax.nn.sigmoid(z @ w2.T + b2)                        # (N, C)
    return x * s[:, :, None, None]


if __name__ == "__main__":
    key = jax.random.PRNGKey(0)
    k_x, k1, k2, k3, k4 = jax.random.split(key, 5)

    N, fea, H, W = 2, 8, 16, 16
    Cr = fea // 4

    # NCHW input, matching the PyTorch module's layout.
    x = jax.random.normal(k_x, (N, fea, H, W), jnp.float32)

    # Conv weights in (out, in) layout (1x1 spatial dims squeezed away).
    w1 = 0.1 * jax.random.normal(k1, (Cr, fea), jnp.float32)
    b1 = 0.01 * jax.random.normal(k2, (Cr,), jnp.float32)
    w2 = 0.1 * jax.random.normal(k3, (fea, Cr), jnp.float32)
    b2 = 0.01 * jax.random.normal(k4, (fea,), jnp.float32)

    fwd = jax.jit(functools.partial(channel_attention, w1=w1, b1=b1, w2=w2, b2=b2))
    out = jax.block_until_ready(fwd(x))

    ref = ref_channel_attention(x, w1, b1, w2, b2)
    assert out.shape == (N, fea, H, W), out.shape
    assert jnp.allclose(out, ref, rtol=1e-5, atol=1e-5), (
        float(jnp.max(jnp.abs(out - ref))))

    print("KERNEL_OK")
</pallas_src>

<mosaic_0001>
module attributes {stable_mosaic.version = 11 : i64} {
  func.func @channel_attention_kernel(%arg0: i32, %arg1: memref<1x8x256xf32, #tpu.memory_space<vmem>>, %arg2: memref<8x7xf32, #tpu.memory_space<vmem>>, %arg3: memref<1x8x256xf32, #tpu.memory_space<vmem>>) attributes {dimension_semantics = [#tpu.dimension_semantics<parallel>], iteration_bounds = array<i64: 2>, scalar_prefetch = 0 : i64, scratch_operands = 0 : i64, tpu.core_type = #tpu.core_type<tc>, window_params = [{transform_indices = @transform_0, window_bounds = array<i64: 1, 8, 256>}, {pipeline_mode = #tpu.pipeline_mode<synchronous>, transform_indices = @transform_1, window_bounds = array<i64: 8, 7>}, {transform_indices = @transform_2, window_bounds = array<i64: 1, 8, 256>}]} {
    %c0 = arith.constant 0 : index
    %c0_0 = arith.constant 0 : index
    %c0_1 = arith.constant 0 : index
    %0 = vector.load %arg1[%c0, %c0_0, %c0_1] : memref<1x8x256xf32, #tpu.memory_space<vmem>>, vector<1x8x256xf32>
    %cst = arith.constant dense<0.000000e+00> : vector<1x8xf32>
    %1 = vector.multi_reduction <add>, %0, %cst [2] : vector<1x8x256xf32> to vector<1x8xf32>
    %2 = vector.shape_cast %1 : vector<1x8xf32> to vector<1x8x1xf32>
    %cst_2 = arith.constant 3.906250e-03 : f32
    %3 = vector.broadcast %cst_2 : f32 to vector<1x8x1xf32>
    %4 = arith.mulf %2, %3 : vector<1x8x1xf32>
    %c0_3 = arith.constant 0 : index
    %c0_4 = arith.constant 0 : index
    %5 = vector.load %arg2[%c0_3, %c0_4] : memref<8x7xf32, #tpu.memory_space<vmem>>, vector<8x7xf32>
    %6 = vector.extract_strided_slice %5 {offsets = [0, 0], sizes = [8, 2], strides = [1, 1]} : vector<8x7xf32> to vector<8x2xf32>
    %7 = vector.extract_strided_slice %5 {offsets = [0, 2], sizes = [8, 2], strides = [1, 1]} : vector<8x7xf32> to vector<8x2xf32>
    %8 = vector.extract_strided_slice %5 {offsets = [0, 4], sizes = [8, 1], strides = [1, 1]} : vector<8x7xf32> to vector<8x1xf32>
    %9 = vector.extract_strided_slice %5 {offsets = [0, 5], sizes = [1, 2], strides = [1, 1]} : vector<8x7xf32> to vector<1x2xf32>
    %10 = vector.shape_cast %6 : vector<8x2xf32> to vector<1x8x2xf32>
    %11 = vector.broadcast %4 : vector<1x8x1xf32> to vector<1x8x2xf32>
    %12 = arith.mulf %10, %11 : vector<1x8x2xf32>
    %cst_5 = arith.constant dense<0.000000e+00> : vector<1x2xf32>
    %13 = vector.multi_reduction <add>, %12, %cst_5 [1] : vector<1x8x2xf32> to vector<1x2xf32>
    %14 = vector.shape_cast %13 : vector<1x2xf32> to vector<1x1x2xf32>
    %15 = vector.shape_cast %9 : vector<1x2xf32> to vector<1x1x2xf32>
    %16 = arith.addf %14, %15 : vector<1x1x2xf32>
    %cst_6 = arith.constant 0.000000e+00 : f32
    %17 = vector.broadcast %cst_6 : f32 to vector<1x1x2xf32>
    %18 = arith.cmpf ogt, %16, %17 : vector<1x1x2xf32>
    %cst_7 = arith.constant 0.000000e+00 : f32
    %19 = vector.broadcast %cst_7 : f32 to vector<1x1x2xf32>
    %20 = arith.minimumf %16, %19 : vector<1x1x2xf32>
    %21 = math.exp %20 : vector<1x1x2xf32>
    %cst_8 = arith.constant 1.000000e+00 : f32
    %22 = vector.broadcast %cst_8 : f32 to vector<1x1x2xf32>
    %23 = arith.subf %21, %22 : vector<1x1x2xf32>
    %24 = arith.select %18, %16, %23 : vector<1x1x2xi1>, vector<1x1x2xf32>
    %25 = vector.shape_cast %7 : vector<8x2xf32> to vector<1x8x2xf32>
    %26 = vector.broadcast %24 : vector<1x1x2xf32> to vector<1x8x2xf32>
    %27 = arith.mulf %25, %26 : vector<1x8x2xf32>
    %cst_9 = arith.constant dense<0.000000e+00> : vector<1x8xf32>
    %28 = vector.multi_reduction <add>, %27, %cst_9 [2] : vector<1x8x2xf32> to vector<1x8xf32>
    %29 = vector.shape_cast %28 : vector<1x8xf32> to vector<1x8x1xf32>
    %30 = vector.shape_cast %8 : vector<8x1xf32> to vector<1x8x1xf32>
    %31 = arith.addf %29, %30 : vector<1x8x1xf32>
    %32 = arith.negf %31 : vector<1x8x1xf32>
    %33 = math.exp %32 : vector<1x8x1xf32>
    %cst_10 = arith.constant 1.000000e+00 : f32
    %34 = vector.broadcast %cst_10 : f32 to vector<1x8x1xf32>
    %35 = arith.addf %34, %33 : vector<1x8x1xf32>
    %36 = arith.divf %34, %35 : vector<1x8x1xf32>
    %37 = vector.broadcast %36 : vector<1x8x1xf32> to vector<1x8x256xf32>
    %38 = arith.mulf %0, %37 : vector<1x8x256xf32>
    %c0_11 = arith.constant 0 : index
    %c0_12 = arith.constant 0 : index
    %c0_13 = arith.constant 0 : index
    %39 = vector.load %arg3[%c0_11, %c0_12, %c0_13] : memref<1x8x256xf32, #tpu.memory_space<vmem>>, vector<1x8x256xf32>
    tpu.vector_store %arg3[%c0_11, %c0_12, %c0_13], %38 {strides = array<i32>} : memref<1x8x256xf32, #tpu.memory_space<vmem>>, vector<1x8x256xf32>,
    return
  }
  func.func @transform_0(%arg0: i32) -> (i32, i32, i32) {
    %c0_i32 = arith.constant 0 : i32
    %c0_i32_0 = arith.constant 0 : i32
    %c0_i32_1 = arith.constant 0 : i32
    return %arg0, %c0_i32, %c0_i32_0 : i32, i32, i32
  }
  func.func @transform_1(%arg0: i32) -> (i32, i32) {
    %c0_i32 = arith.constant 0 : i32
    %c0_i32_0 = arith.constant 0 : i32
    %c0_i32_1 = arith.constant 0 : i32
    return %c0_i32, %c0_i32_0 : i32, i32
  }
  func.func @transform_2(%arg0: i32) -> (i32, i32, i32) {
    %c0_i32 = arith.constant 0 : i32
    %c0_i32_0 = arith.constant 0 : i32
    %c0_i32_1 = arith.constant 0 : i32
    return %arg0, %c0_i32, %c0_i32_0 : i32, i32, i32
  }
}

</mosaic_0001>

<bundles_post_ra>
// kernel: channel_attention.1
= control target key start
LH: loop header
LB: loop body
LE: loop exit
PB: predicated region body
PF: predicated region fallthrough
CT: control target
= control target key end

     0   :  { %s319_s9 = smov 0   ;;  %s348_s0 = inlined_call_operand.vmem [shape: f32[2,8,256], index: 0, kind: input, shape index: {}, may-alias: {0,2}]   ;;  %s349_s1 = inlined_call_operand.vmem [shape: f32[8,7], index: 1, kind: input, shape index: {}]   ;;  %s350_s2 = inlined_call_operand.vmem [shape: f32[2,8,256], index: 2, kind: output, shape index: {}, may-alias: {0,2}]  }
   0x1 LB: > { %s258_s10 = sadd.s32 4294967295, %s298_s9   ;;  %p262_p0 = scmp.ge.s32.totalorder %s298_s9, 1  ;;  %s298_s9 = sphi %s319_s9, %s12_s9  }
   0x2   : > { %p112_p1 = scmp.lt.s32.totalorder %s298_s9, 3 }
   0x4   : > { %p113_p2 = pnand %p262_p0, %p112_p1 }
   0x5   : > { %p134_p3 = scmp.lt.s32.totalorder (!%p113_p2), %s258_s10, 1  ;;  %v150_v3 = vld [vmem:[%s349_s1] sm:$0xff] (!%p113_p2)  ;;  %s300_s17 = smov (!%p113_p2), 123   ;;  %vm152_vm0 = vcmask (!%p113_p2), 15360   ;;  %v171_v18 = vlaneseq (!%p113_p2)  ;;  %v303_v29 = vmov (!%p113_p2), 4  }
   0x6   : > { %116 = sbr.rel (%p113_p2) target bundleno = 734 (0x2de), region = 28  ;;  %s301_s18 = smov (!%p113_p2), 2   ;;  %285 = vset.pattern.permute.xlu0 (!%p113_p2), %v303_v29 }
   0x7   : > { %v172_v19 = vshrl.u32 (!%p113_p2), %v171_v18, 7  ;;  %s302_s19 = smov (!%p113_p2), 126  }
   0x9   : > { %v173_v21 = vsub.s32 (!%p113_p2), 0, %v172_v19 }
   0xd   : > { %s352_s10 = smov (!%p134_p3, %s258_s10), 1 }
   0xe   : > { %s271_s11 = sshll.u32 %s352_s10, 4 }
   0xf   : > { %s138_s14 = scalar_lea.vmem %s348_s0, %s271_s11  ;;  %s143_s22 = scalar_lea.vmem %s350_s2, %s271_s11 }
  0x10   : > { %v144_v0 = vld [vmem:[%s138_s14] sm:$0xff]  ;;  %v145_v1 = vld [vmem:[%s138_s14 + $0x8] sm:$0xff] }
  0x11   : > { %v146_v2 = vadd.f32 %v145_v1, %v144_v0 }
  0x13   : > { %147 = vadd.xlane.f32.xlu0 %v146_v2 }
  0x29   : > { %161 = vrot.lane.b32.xlu0 %v150_v3, %s300_s17 }
  0xa0   : > { %v148_v4 = vpop.xlane.xlu0 %147 }
  0xa1   : > { %v149_v5 = vmul.f32 0.00390625, %v148_v4 }
  0xa3   : > { %v151_v6 = vmul.f32 %v150_v3, %v149_v5 }
  0xa4   : > { %v162_v13 = vpop.permute.xlu0 %161 }
  0xa5   : > { %v153_v7 = vsel %vm152_vm0, %v151_v6, 0.0 }
  0xa6   : > { %v154_v8 = vrot.slane %v153_v7, 4 }
  0xa8   : > { %v155_v9 = vadd.f32 %v154_v8, %v153_v7 }
  0xaa   : > { %v156_v10 = vrot.slane %v155_v9, 2 }
  0xac   : > { %v157_v11 = vadd.f32 %v156_v10, %v155_v9 }
  0xae   : > { %v158_v12 = vrot.slane %v157_v11, 1 }
  0xb0   : > { %v159_v14 = vadd.f32 %v158_v12, %v157_v11 }
  0xb2   : > { %v164_v15 = vadd.f32 %v162_v13, %v159_v14 }
  0xb4   : > { %v166_v16 = vmin.f32 %v164_v15, 0.0  ;;  %vm165_vm1 = vcmp.gt.f32.partialorder %v164_v15, 0.0 }
  0xb6   : > { %v167_v17 = vmul.f32 1.442695, %v166_v16 }
  0xb8   : > { %286 = vpow2.f32 %v167_v17 }
  0xc2   : > { %v287_v20 = vpop.eup %286 }
  0xc3   : > { %v267_v22 = vadd.f32 -1.0, %v287_v20 }
  0xc5   : > { %v170_v23 = vsel %vm165_vm1, %v164_v15, %v267_v22 }
  0xc6   : > { %v174_v24 = vrot.slane %v170_v23, %v173_v21 }
  0xc8   : > { %176 = vrot.lane.b32.xlu1 %v174_v24, %s301_s18 }
 0x13a   : > { %v177_v25 = vpop.permute.xlu1 %176 }
 0x13b   : > { %v179_v26 = vmul.f32 %v177_v25, %v150_v3 }
 0x13d   : > { %181 = vrot.lane.b32.xlu1 %v179_v26, %s302_s19 }
 0x1af   : > { %v182_v27 = vpop.permute.xlu1 %181 }
 0x1b0   : > { %v184_v28 = vsel %vm152_vm0, %v182_v27, 0.0 }
 0x1b1   : > { %185 = vadd.xlane.f32.xlu1 %v184_v28 }
 0x23e   : > { %v186_v30 = vpop.xlane.xlu1 %185 }
 0x23f   : > { %v187_v31 = vadd.f32 %v186_v30, %v150_v3 }
 0x241   : > { %v268_v32 = vmul.f32 -1.442695, %v187_v31 }
 0x243   : > { %288 = vpow2.f32 %v268_v32 }
 0x24d   : > { %v289_v33 = vpop.eup %288 }
 0x24e   : > { %v191_v34 = vadd.f32 1.0, %v289_v33 }
 0x250   : > { %290 = vrcp.f32 %v191_v34 }
 0x25a   : > { %v291_v35 = vpop.eup %290 }
 0x25b   : > { %196 = vperm.xlu0 %285, %v291_v35  }
 0x2da   : > { %v197_v36 = vpop.permute.xlu0 %196 }
 0x2db   : > { %v199_v37 = vmul.f32 %v197_v36, %v144_v0  ;;  %v200_v38 = vmul.f32 %v197_v36, %v145_v1 }
 0x2dd   : > { %201 = vst [vmem:[%s143_s22] sm:$0xff] %v199_v37  ;;  %202 = vst [vmem:[%s143_s22 + $0x8] sm:$0xff] %v200_v38 }
 0x2de PF: > { %s12_s9 = sadd.s32 1, %s298_s9  }
 0x2df   : > { %p9_p4 = scmp.ge.s32.totalorder %s12_s9, 4  }
 0x2e1   :  { %11 = sbr.rel (!%p9_p4) target bundleno = 1 (0x1), region = 58 }

</bundles_post_ra>
